<compile_context>
chip_gen: v7x
topology: tpu7x:2x2x1
jax: 0.10.0
libtpu: 0.0.40
codegen_flags: <defaults>
</compile_context>

<pallas_src>
import functools

import jax
import jax.numpy as jnp
from jax.experimental import pallas as pl
from jax.experimental.pallas import tpu as pltpu


def _round_up(n: int, m: int) -> int:
    return ((n + m - 1) // m) * m


def _cdiv(a: int, b: int) -> int:
    return (a + b - 1) // b


def _tile_m(B: int) -> int:
    # Batch tile: 8-aligned (f32 sublane), capped at 512, split evenly.
    Bp = _round_up(B, 8)
    return _round_up(_cdiv(Bp, _cdiv(Bp, 512)), 8)


def _tile_n(C: int) -> int:
    # Class tile: lane-dense (>=128), capped at 512, split evenly.
    Cp = _round_up(C, 128)
    return _round_up(_cdiv(Cp, _cdiv(Cp, 512)), 128)


def _tile_k(E: int) -> int:
    # Reduction tile: lane-dense, capped at 1024 (1-2 K steps typical).
    Ep = _round_up(E, 128)
    return _round_up(_cdiv(Ep, _cdiv(Ep, 1024)), 128)


def prepare_classifier_params(weight, bias, *, param_dtype=jnp.bfloat16):
    """One-time parameter prep (hoisted out of the per-call hot path).

    weight: (C, E) as in nn.Linear; bias: (C,).
    Returns (w_prepped (Ep, Cp) param_dtype, bias_prepped (1, Cp) f32).
    """
    C, E = weight.shape
    assert bias.shape == (C,)
    tn, tk = _tile_n(C), _tile_k(E)
    Cp, Ep = _round_up(C, tn), _round_up(E, tk)
    wt = weight.T  # (E, C): kernel becomes a plain (M,K)x(K,N) matmul.
    if (Ep, Cp) != (E, C):
        wt = jnp.pad(wt, ((0, Ep - E), (0, Cp - C)))
    wt = wt.astype(param_dtype)
    b = bias if Cp == C else jnp.pad(bias, (0, Cp - C))
    return wt, b.reshape(1, Cp).astype(jnp.float32)


def _kernel_single_k(x_ref, w_ref, b_ref, o_ref, *, compute_dtype):
    # Whole reduction in one step: dot + bias straight into o_ref.
    # Dropout (eval mode) is identity.
    # TODO(synk): training-mode dropout (pltpu.prng_seed + stateful_bernoulli)
    # is not wired in.
    x = x_ref[...].astype(compute_dtype)
    acc = jnp.dot(x, w_ref[...], preferred_element_type=jnp.float32)
    o_ref[...] = (acc + b_ref[...]).astype(o_ref.dtype)


def _kernel_multi_k(x_ref, w_ref, b_ref, o_ref, acc_ref, *, compute_dtype):
    # K-tiled reduction with an f32 VMEM accumulator resident over the K axis.
    k = pl.program_id(2)

    @pl.when(k == 0)
    def _():
        acc_ref[...] = jnp.zeros_like(acc_ref)

    x = x_ref[...].astype(compute_dtype)
    acc_ref[...] += jnp.dot(x, w_ref[...], preferred_element_type=jnp.float32)

    @pl.when(k == pl.num_programs(2) - 1)
    def _():
        o_ref[...] = (acc_ref[...] + b_ref[...]).astype(o_ref.dtype)


def classifier_forward(x, w_prepped, b_prepped, *, num_classes,
                       compute_dtype=jnp.bfloat16, out_dtype=None):
    """x: (B, E) f32; w_prepped/b_prepped from prepare_classifier_params."""
    B, E = x.shape
    Ep, Cp = w_prepped.shape
    C = num_classes
    out_dtype = out_dtype if out_dtype is not None else x.dtype

    tm, tn, tk = _tile_m(B), _tile_n(C), _tile_k(E)
    assert Ep == _round_up(E, tk) and Cp == _round_up(C, tn), \
        "prepared params don't match this (E, C) tiling"
    Bp = _round_up(B, tm)

    # Only x is padded per call (B*E bytes, small vs. the weight).
    if (Bp, Ep) != (B, E):
        x = jnp.pad(x, ((0, Bp - B), (0, Ep - E)))

    grid_m, grid_n, grid_k = Bp // tm, Cp // tn, Ep // tk
    # v7x megacore: split the class axis when possible so each core streams a
    # disjoint half of W (splitting M would duplicate W traffic on shared HBM).
    m_sem = "arbitrary" if grid_n >= 2 else "parallel"

    compiler_params_kw = dict(vmem_limit_bytes=32 * 1024 * 1024)

    if grid_k == 1:
        # Fast path: no accumulator scratch, no init/finalize passes.
        kernel = functools.partial(_kernel_single_k, compute_dtype=compute_dtype)
        out = pl.pallas_call(
            kernel,
            out_shape=jax.ShapeDtypeStruct((Bp, Cp), out_dtype),
            grid_spec=pltpu.PrefetchScalarGridSpec(
                num_scalar_prefetch=0,
                grid=(grid_m, grid_n),
                in_specs=[
                    pl.BlockSpec((tm, Ep), lambda i, j: (i, 0)),   # x (f32)
                    pl.BlockSpec((Ep, tn), lambda i, j: (0, j)),   # W.T (bf16 at rest)
                    pl.BlockSpec((1, tn), lambda i, j: (0, j)),    # bias (f32)
                ],
                out_specs=pl.BlockSpec((tm, tn), lambda i, j: (i, j)),
            ),
            compiler_params=pltpu.CompilerParams(
                dimension_semantics=(m_sem, "parallel"),
                **compiler_params_kw,
            ),
        )(x, w_prepped, b_prepped)
    else:
        kernel = functools.partial(_kernel_multi_k, compute_dtype=compute_dtype)
        out = pl.pallas_call(
            kernel,
            out_shape=jax.ShapeDtypeStruct((Bp, Cp), out_dtype),
            grid_spec=pltpu.PrefetchScalarGridSpec(
                num_scalar_prefetch=0,
                grid=(grid_m, grid_n, grid_k),
                in_specs=[
                    pl.BlockSpec((tm, tk), lambda i, j, k: (i, k)),  # x (f32)
                    pl.BlockSpec((tk, tn), lambda i, j, k: (k, j)),  # W.T (bf16)
                    pl.BlockSpec((1, tn), lambda i, j, k: (0, j)),   # bias (f32)
                ],
                out_specs=pl.BlockSpec((tm, tn), lambda i, j, k: (i, j)),
                scratch_shapes=[pltpu.VMEM((tm, tn), jnp.float32)],
            ),
            compiler_params=pltpu.CompilerParams(
                dimension_semantics=(m_sem, "parallel", "arbitrary"),
                **compiler_params_kw,
            ),
        )(x, w_prepped, b_prepped)

    if Bp != B or Cp != C:
        out = out[:B, :C]
    return out


if __name__ == "__main__":
    key = jax.random.PRNGKey(0)

    def make_case(k, batch, embedding_size, num_classes):
        kx, kw, kb = jax.random.split(k, 3)
        bound = 1.0 / (embedding_size ** 0.5)
        x = jax.random.normal(kx, (batch, embedding_size), dtype=jnp.float32)
        weight = jax.random.uniform(
            kw, (num_classes, embedding_size),
            minval=-bound, maxval=bound, dtype=jnp.float32)
        bias = jax.random.uniform(
            kb, (num_classes,), minval=-bound, maxval=bound, dtype=jnp.float32)
        return x, weight, bias

    def reference(x, weight, bias, compute_dtype):
        # Same bf16 operand rounding + f32 accumulation as the kernel.
        return jnp.dot(
            x.astype(compute_dtype), weight.astype(compute_dtype).T,
            preferred_element_type=jnp.float32) + bias

    k1, k2 = jax.random.split(key)

    # Toy shapes implied by the module: single-K-step fast path, (1, 1) grid.
    x, w, b = make_case(k1, batch=16, embedding_size=32, num_classes=8)
    wp, bp = prepare_classifier_params(w, b)           # one-time param prep
    out = jax.block_until_ready(
        classifier_forward(x, wp, bp, num_classes=8))
    assert out.shape == (16, 8)
    ref = reference(x, w, b, jnp.bfloat16)
    assert jnp.allclose(out, ref, atol=2e-3, rtol=2e-3), \
        float(jnp.max(jnp.abs(out - ref)))

    # Larger case exercising the 3-D grid (1, 2, 2): K-axis accumulator,
    # N tiling (class-axis megacore split), and the pad/slice paths.
    x2, w2, b2 = make_case(k2, batch=200, embedding_size=1300, num_classes=700)
    wp2, bp2 = prepare_classifier_params(w2, b2)
    out2 = jax.block_until_ready(
        classifier_forward(x2, wp2, bp2, num_classes=700))
    assert out2.shape == (200, 700)
    ref2 = reference(x2, w2, b2, jnp.bfloat16)
    assert jnp.allclose(out2, ref2, atol=2e-3, rtol=2e-3), \
        float(jnp.max(jnp.abs(out2 - ref2)))

    print("KERNEL_OK")
</pallas_src>

<mosaic_0001>
module attributes {stable_mosaic.version = 11 : i64} {
  func.func @_kernel_single_k(%arg0: i32, %arg1: i32, %arg2: memref<16x128xf32, #tpu.memory_space<vmem>>, %arg3: memref<128x128xbf16, #tpu.memory_space<vmem>>, %arg4: memref<1x128xf32, #tpu.memory_space<vmem>>, %arg5: memref<16x128xf32, #tpu.memory_space<vmem>>) attributes {dimension_semantics = [#tpu.dimension_semantics<parallel>, #tpu.dimension_semantics<parallel>], iteration_bounds = array<i64: 1, 1>, scalar_prefetch = 0 : i64, scratch_operands = 0 : i64, tpu.core_type = #tpu.core_type<tc>, window_params = [{transform_indices = @transform_0, window_bounds = array<i64: 16, 128>}, {transform_indices = @transform_1, window_bounds = array<i64: 128, 128>}, {transform_indices = @transform_2, window_bounds = array<i64: 1, 128>}, {transform_indices = @transform_3, window_bounds = array<i64: 16, 128>}]} {
    %c0 = arith.constant 0 : index
    %c0_0 = arith.constant 0 : index
    %0 = vector.load %arg2[%c0, %c0_0] : memref<16x128xf32, #tpu.memory_space<vmem>>, vector<16x128xf32>
    %1 = arith.truncf %0 : vector<16x128xf32> to vector<16x128xbf16>
    %c0_1 = arith.constant 0 : index
    %c0_2 = arith.constant 0 : index
    %2 = vector.load %arg3[%c0_1, %c0_2] : memref<128x128xbf16, #tpu.memory_space<vmem>>, vector<128x128xbf16>
    %cst = arith.constant dense<0.000000e+00> : vector<16x128xf32>
    %3 = tpu.matmul %1, %2, %cst {dimension_numbers = #tpu.dot_dimension_numbers<[1], [0], [0], [1], [0, 0, 1, 1], [], []>} : vector<16x128xbf16>, vector<128x128xbf16>, vector<16x128xf32> -> vector<16x128xf32>
    %c0_3 = arith.constant 0 : index
    %c0_4 = arith.constant 0 : index
    %4 = vector.load %arg4[%c0_3, %c0_4] : memref<1x128xf32, #tpu.memory_space<vmem>>, vector<1x128xf32>
    %5 = vector.broadcast %4 : vector<1x128xf32> to vector<16x128xf32>
    %6 = arith.addf %3, %5 : vector<16x128xf32>
    %c0_5 = arith.constant 0 : index
    %c0_6 = arith.constant 0 : index
    %7 = vector.load %arg5[%c0_5, %c0_6] : memref<16x128xf32, #tpu.memory_space<vmem>>, vector<16x128xf32>
    tpu.vector_store %arg5[%c0_5, %c0_6], %6 {strides = array<i32>} : memref<16x128xf32, #tpu.memory_space<vmem>>, vector<16x128xf32>,
    return
  }
  func.func @transform_0(%arg0: i32, %arg1: i32) -> (i32, i32) {
    %c0_i32 = arith.constant 0 : i32
    %c0_i32_0 = arith.constant 0 : i32
    return %arg0, %c0_i32 : i32, i32
  }
  func.func @transform_1(%arg0: i32, %arg1: i32) -> (i32, i32) {
    %c0_i32 = arith.constant 0 : i32
    %c0_i32_0 = arith.constant 0 : i32
    return %c0_i32, %arg1 : i32, i32
  }
  func.func @transform_2(%arg0: i32, %arg1: i32) -> (i32, i32) {
    %c0_i32 = arith.constant 0 : i32
    %c0_i32_0 = arith.constant 0 : i32
    return %c0_i32, %arg1 : i32, i32
  }
  func.func @transform_3(%arg0: i32, %arg1: i32) -> (i32, i32) {
    %c0_i32 = arith.constant 0 : i32
    return %arg0, %arg1 : i32, i32
  }
}

</mosaic_0001>

<bundles_post_ra>
// kernel: tpu_custom_call.1
= control target key start
LH: loop header
LB: loop body
LE: loop exit
PB: predicated region body
PF: predicated region fallthrough
CT: control target
= control target key end

     0   :  { %8 = vsyncpa [#allocation3], 0  ;;  %s380_s0 = inlined_call_operand.hbm [shape: f32[16,128], index: 0, kind: input, shape index: {}]   ;;  %s381_s1 = inlined_call_operand.hbm [shape: bf16[128,128], index: 1, kind: input, shape index: {}]   ;;  %s382_s2 = inlined_call_operand.vmem [shape: f32[1,128], index: 2, kind: input, shape index: {}]   ;;  %s383_s3 = inlined_call_operand.hbm [shape: f32[16,128], index: 3, kind: output, shape index: {}]  }
   0x1   :  { %9 = vsyncpa [#allocation6], 0 }
   0x2   :  { %10 = vsyncpa [#allocation4], 0  ;;  %s306_s12 = smov [#allocation2]   ;;  %s234_s16 = scalar_lea.hbm %s380_s0, 256 }
   0x3   :  { %s16_s13 = sshll.u32 %s306_s12, 4  ;;  %p235_p0 = scmp.ne.s32.totalorder %s380_s0, %s234_s16  ;;  %s17_s13 = int_to_ptr.vmem [resolvable:$true] %s16_s13 }
   0x4   :  { %p238_p1 = scmp.lt.u32.totalorder %s234_s16, %s380_s0 }
   0x6   :  { %p240_p2 = pnand %p238_p1, %p235_p0 }
   0x8   :  { %243 = shalt.err (!%p240_p2)
}
   0x9   :  { %s244_s21 = scalar_lea.vmem %s17_s13, 256  ;;  %p249_p4 = scmp.lt.s32.totalorder %s17_s13, %s17_s13 }
   0xa   :  { %p245_p3 = scmp.ne.s32.totalorder %s17_s13, %s244_s21  ;;  %p250_p5 = scmp.lt.s32.totalorder %s244_s21, %s244_s21 }
   0xc   :  { %p251_p6 = por %p250_p5, %p249_p4 }
   0xe   :  { %p252_p7 = pnand %p251_p6, %p245_p3 }
  0x10   :  { %255 = shalt.err (!%p252_p7)
}
  0x11   :  { %s307_s22 = smov 128   ;;  %s308_s23 = smov 8  }
  0x12   :  { %22 = dma.hbm_to_vmem [thread:$0]  %s380_s0, 256, %s17_s13, [#allocation3], %s307_s22, %s307_s22, %s308_s23  }
  0x13   :  { %s309_s26 = smov [#allocation5]   ;;  %s256_s30 = scalar_lea.hbm %s381_s1, 1024 }
  0x14   :  { %s28_s27 = sshll.u32 %s309_s26, 4  ;;  %p257_p8 = scmp.ne.s32.totalorder %s381_s1, %s256_s30  ;;  %s29_s27 = int_to_ptr.vmem [resolvable:$true] %s28_s27 }
  0x15   :  { %p260_p9 = scmp.lt.u32.totalorder %s256_s30, %s381_s1 }
  0x17   :  { %p262_p10 = pnand %p260_p9, %p257_p8 }
  0x19   :  { %265 = shalt.err (!%p262_p10)
}
  0x1a   :  { %s266_s8 = scalar_lea.vmem %s29_s27, 1024  ;;  %p271_p12 = scmp.lt.s32.totalorder %s29_s27, %s29_s27 }
  0x1b   :  { %p267_p11 = scmp.ne.s32.totalorder %s29_s27, %s266_s8  ;;  %p272_p13 = scmp.lt.s32.totalorder %s266_s8, %s266_s8 }
  0x1d   :  { %p273_p0 = por %p272_p13, %p271_p12 }
  0x1f   :  { %p274_p1 = pnand %p273_p0, %p267_p11 }
  0x21   :  { %277 = shalt.err (!%p274_p1)
}
  0x22   :  { %s310_s0 = smov 64   ;;  %s311_s9 = smov 4  }
  0x23   :  { %34 = dma.hbm_to_vmem [thread:$0]  %s381_s1, 1024, %s29_s27, [#allocation6], %s310_s0, %s310_s0, %s311_s9  }
  0x24   :  { %300 = dma.done.wait [#allocation3], 256  }
  0x25   :  { %301 = vsyncadd [#allocation3], 4294967040 }
  0x26   :  { %302 = dma.done.wait [#allocation6], 1024  }
  0x27   :  { %303 = vsyncadd [#allocation6], 4294966272  ;;  %v312_v0 = vmov 0.0   ;;  %vm313_vm0 = vmmov 0   ;;  %v226_v1 = vld [vmem:[#allocation5] sm:$0xff]   ;;  %v227_v2 = vld [vmem:[#allocation5 + $0x8] sm:$0xff]  }
  0x28   :  { %197 = vmatprep.subr.bf16.mxu0 %v312_v0  ;;  %213 = vmatprep.mubr.msk.bf16.mxu0 %vm313_vm0, %v312_v0  ;;  %v228_v3 = vld [vmem:[#allocation5 + $0x10] sm:$0xff]   ;;  %v229_v4 = vld [vmem:[#allocation5 + $0x18] sm:$0xff]   ;;  %v230_v5 = vld [vmem:[#allocation5 + $0x20] sm:$0xff]   ;;  %s314_s13 = smov [#allocation7]  }
  0x29   :  { %198 = vmatpush3.bf16.msra.mxu0 %v226_v1  ;;  %v231_v6 = vld [vmem:[#allocation5 + $0x28] sm:$0xff]   ;;  %v232_v7 = vld [vmem:[#allocation5 + $0x30] sm:$0xff]   ;;  %v233_v8 = vld [vmem:[#allocation5 + $0x38] sm:$0xff]   ;;  %s166_s14 = sshll.u32 %s314_s13, 4  ;;  %s167_s14 = int_to_ptr.vmem [resolvable:$true] %s166_s14 }
  0x2a   :  { %199 = vmatprep.subr.bf16.mxu0 %v312_v0  ;;  %v44_v9 = vld [vmem:[#allocation2] sm:$0xff]  ;;  %v45_v10 = vld [vmem:[#allocation2 + $0x8] sm:$0xff]  ;;  %s278_s15 = scalar_lea.vmem %s167_s14, 256  ;;  %p283_p3 = scmp.lt.s32.totalorder %s167_s14, %s167_s14 }
  0x2b   :  { %v46_v11 = vpack.c.bf16 %v45_v10, %v44_v9  ;;  %v179_v12 = vld [vmem:[%s382_s2] ss:$0 sm:$0xff]  ;;  %p279_p2 = scmp.ne.s32.totalorder %s167_s14, %s278_s15  ;;  %p284_p4 = scmp.lt.s32.totalorder %s278_s15, %s278_s15 }
  0x2d   :  { %200 = vmatpush3.bf16.msra.mxu0 %v227_v2  ;;  %p285_p5 = por %p284_p4, %p283_p3 }
  0x2e   :  { %201 = vmatprep.subr.bf16.mxu0 %v312_v0 }
  0x2f   :  { %p286_p6 = pnand %p285_p5, %p279_p2 }
  0x31   :  { %202 = vmatpush3.bf16.msra.mxu0 %v228_v3 }
  0x32   :  { %203 = vmatprep.subr.bf16.mxu0 %v312_v0 }
  0x35   :  { %204 = vmatpush3.bf16.msra.mxu0 %v229_v4 }
  0x36   :  { %205 = vmatprep.subr.bf16.mxu0 %v312_v0 }
  0x39   :  { %206 = vmatpush3.bf16.msra.mxu0 %v230_v5 }
  0x3a   :  { %207 = vmatprep.subr.bf16.mxu0 %v312_v0 }
  0x3d   :  { %208 = vmatpush3.bf16.msra.mxu0 %v231_v6 }
  0x3e   :  { %209 = vmatprep.subr.bf16.mxu0 %v312_v0 }
  0x41   :  { %210 = vmatpush3.bf16.msra.mxu0 %v232_v7 }
  0x42   :  { %211 = vmatprep.subr.bf16.mxu0 %v312_v0 }
  0x45   :  { %212 = vmatpush3.bf16.msra.mxu0 %v233_v8 }
  0x48   :  { %214 = vmatmul.mubr.bf16.vlgmr.msra.gmra.mrb[0].mxu0 %v46_v11 }
 0x11b   :  { %v152_v13 = vpop.f32.mrb[0].mxu0 }
 0x11c   :  { %v153_v14 = vadd.f32 %v179_v12, %v152_v13  ;;  %v215_v15 = vpop.f32.mrb[1].mxu0 }
 0x11d   :  { %v155_v16 = vpop.f32.mrb[2].mxu0 }
 0x11e   :  { %159 = vst [vmem:[#allocation7] sm:$0xff] %v153_v14  ;;  %v156_v17 = vadd.f32 %v179_v12, %v155_v16  ;;  %v216_v18 = vpop.f32.mrb[3].mxu0 }
 0x120   :  { %160 = vst [vmem:[#allocation7 + $0x8] sm:$0xff] %v156_v17 }
 0x121   :  { %289 = shalt.err (!%p286_p6)
}
 0x122   :  { %s290_s17 = scalar_lea.hbm %s383_s3, 256 }
 0x123   :  { %p291_p7 = scmp.ne.s32.totalorder %s383_s3, %s290_s17  ;;  %p294_p8 = scmp.lt.u32.totalorder %s290_s17, %s383_s3 }
 0x125   :  { %p296_p9 = pnand %p294_p8, %p291_p7 }
 0x127   :  { %299 = shalt.err (!%p296_p9)
}
 0x128   :  { %172 = dma.vmem_to_hbm [thread:$0]  %s167_s14, 256, %s383_s3, [#allocation4], %s307_s22, %s307_s22, %s308_s23  }
 0x129   :  { %304 = dma.done.wait [#allocation4], 256  }
 0x12a   :  { %305 = vsyncadd [#allocation4], 4294967040 }
 0x12b   :  { %176 = vsyncpa [#allocation3], 1 }
 0x12c   :  { %177 = vsyncpa [#allocation6], 1 }
 0x12d   :  { %178 = vsyncpa [#allocation4], 1 }

</bundles_post_ra>
